<compile_context>
chip_gen: v7x
topology: tpu7x:2x2x1
jax: 0.10.0
libtpu: 0.0.40
codegen_flags: <defaults>
</compile_context>

<pallas_src>
from functools import partial

import jax
import jax.numpy as jnp
from jax import lax
from jax.experimental import pallas as pl
from jax.experimental.pallas import tpu as pltpu

FILTERS = 256
HIDDEN_UNITS = 64
SEQ_LEN = 90
IN_FEATURES = 2 * HIDDEN_UNITS * SEQ_LEN   # 11520
OUT_FEATURES = 1

_LANES = 128


def _vmem_capacity_bytes():
    """Per-TensorCore VMEM capacity; conservative fallback if query fails."""
    try:
        info = pltpu.get_tpu_info()
        cap = int(getattr(info, "vmem_capacity_bytes", 0))
        if cap > 0:
            return cap
    except Exception:
        pass
    return 64 * 1024 * 1024   # v7x per-TC size (smallest current generation)


def _pick_tile_b(batch, k, itemsize, vmem_cap):
    """Pick the batch tile: as large as VMEM comfortably allows (double-
    buffered), capped at 512, and arranged so big batches give an even
    number of grid steps (v7x megacore balance)."""
    bytes_per_row = k * itemsize
    tb = (vmem_cap // 2) // (2 * bytes_per_row)     # ~50% of VMEM for x stream
    tb = max(8, min(512, (tb // 8) * 8))
    if batch <= tb:
        if batch >= 64:
            # Split into 2 steps so both v7x TensorCores get work.
            tb = max(8, ((batch + 15) // 16) * 8)   # ~ceil(batch/2), 8-aligned
        else:
            tb = batch                              # full-extent block (always legal)
    else:
        steps = -(-batch // tb)
        if steps % 2:                               # prefer an even step count
            tb2 = max(8, ((-(-batch // (steps + 1))) + 7) // 8 * 8)
            if (-(-batch // tb2)) % 2 == 0:
                tb = tb2
    return tb


def _disc_kernel(x_ref, w_ref, b_ref, o_ref, *, total_rows):
    # x_ref: (tb, K) VMEM   w_ref: (1, K) f32 VMEM   b_ref: (1, 1) f32 SMEM
    # o_ref: (tb, 1) f32 VMEM
    tb, K = x_ref.shape
    kg = K // _LANES                        # number of 128-lane groups (90 here)
    n_sub = 1
    for cand in (10, 9, 8, 6, 5, 4, 3, 2):  # statically-unrolled slices per step
        if kg % cand == 0:
            n_sub = cand
            break
    chunk = n_sub * _LANES

    def body(i, acc):
        base = pl.multiple_of(i * chunk, _LANES)
        for s in range(n_sub):              # static unroll: tiny per-op shapes,
            off = pl.multiple_of(base + s * _LANES, _LANES)   # no big VMEM temps
            xc = x_ref[:, pl.ds(off, _LANES)].astype(jnp.float32)
            wc = w_ref[:, pl.ds(off, _LANES)].astype(jnp.float32)
            acc = acc + xc * wc              # VPU fma, f32 accumulate
        return acc

    acc = lax.fori_loop(0, kg // n_sub, body,
                        jnp.zeros((tb, _LANES), jnp.float32))

    # One cross-lane (XLU) reduce at the end, then bias from SMEM.
    z = jnp.sum(acc, axis=-1, keepdims=True) + b_ref[0, 0]     # (tb, 1)

    # Partial last batch tile: mask padded rows so garbage never reaches exp()
    # (writes past B are dropped anyway; this avoids inf/NaN lanes).
    if total_rows % tb != 0:
        row = lax.broadcasted_iota(jnp.int32, (tb, 1), 0)
        valid = (pl.program_id(0) * tb + row) < total_rows
        z = jnp.where(valid, z, 0.0)

    o_ref[...] = (1.0 / (1.0 + jnp.exp(-z))).astype(o_ref.dtype)


def discriminator_forward(x, w, b, *, tile_b=None, out_dtype=jnp.float32):
    """sigmoid(reshape(x, (B, -1)) @ w.T + b) -> (B, 1) in `out_dtype`.

    x: (B, ...) with prod(...) == IN_FEATURES (e.g. (B, 90, 128)); may be
       f32 or bf16 (bf16 halves the dominant HBM read; accumulation is f32).
    w: (1, IN_FEATURES)   -- PyTorch nn.Linear weight layout
    b: bias with OUT_FEATURES elements
    """
    B = x.shape[0]
    x2 = x.reshape(B, -1)
    K = x2.shape[1]
    assert w.shape == (OUT_FEATURES, K), (w.shape, K)
    assert K % _LANES == 0, "in_features must be a multiple of 128"

    # Pre-cast the (tiny) weight/bias once so there is no per-step cast.
    w_in = w.astype(jnp.float32)
    b_in = jnp.reshape(b, (1, OUT_FEATURES)).astype(jnp.float32)

    itemsize = jnp.dtype(x2.dtype).itemsize
    vmem_cap = _vmem_capacity_bytes()
    if tile_b is None:
        tb = _pick_tile_b(B, K, itemsize, vmem_cap)
    else:
        tb = B if tile_b >= B else max(8, (tile_b // 8) * 8)
    grid = (pl.cdiv(B, tb),)

    # Scoped-VMEM limit: double-buffered x tiles + (1,K) f32 weight block
    # (sublane-padded, 2 bufs) + headroom for output blocks / Mosaic scratch.
    x_stream_bytes = 2 * tb * K * itemsize
    w_block_bytes = 2 * 8 * K * 4
    vmem_limit = min(max(32 << 20, x_stream_bytes + w_block_bytes + (8 << 20)),
                     vmem_cap)

    cost = pl.CostEstimate(
        flops=2 * B * K,
        transcendentals=B,                                   # one exp per row
        bytes_accessed=B * K * itemsize + K * 4 + B * 4 + 4,
    )

    return pl.pallas_call(
        partial(_disc_kernel, total_rows=B),
        out_shape=jax.ShapeDtypeStruct((B, OUT_FEATURES), out_dtype),
        grid=grid,
        in_specs=[
            # Streamed, auto double-buffered activation tiles.
            pl.BlockSpec((tb, K), lambda i: (i, 0)),
            # Weight row: constant block index -> fetched once, resident in VMEM.
            pl.BlockSpec((1, K), lambda i: (0, 0)),
            # Bias scalar lives in SMEM.
            pl.BlockSpec(memory_space=pltpu.MemorySpace.SMEM),
        ],
        out_specs=pl.BlockSpec((tb, OUT_FEATURES), lambda i: (i, 0)),
        compiler_params=pltpu.CompilerParams(
            dimension_semantics=("parallel",),    # megacore-split the batch (v7x)
            vmem_limit_bytes=int(vmem_limit),
        ),
        cost_estimate=cost,
    )(x2, w_in, b_in)


def init_params(key, dtype=jnp.float32):
    """nn.Linear default init: U(-1/sqrt(fan_in), 1/sqrt(fan_in))."""
    kw, kb = jax.random.split(key)
    bound = 1.0 / float(IN_FEATURES) ** 0.5
    w = jax.random.uniform(kw, (OUT_FEATURES, IN_FEATURES), dtype,
                           minval=-bound, maxval=bound)
    b = jax.random.uniform(kb, (1, OUT_FEATURES), dtype,
                           minval=-bound, maxval=bound)
    return w, b


# TODO(synk): lstm1 / lstm2 / fc1 exist in the PyTorch module but are never
# called in forward(), so they are intentionally not implemented here.

if __name__ == "__main__":
    key = jax.random.PRNGKey(0)
    k_x1, k_x2, k_p = jax.random.split(key, 3)
    w, b = init_params(k_p)

    # Case 1: f32 activations, single full-extent batch tile.
    B1 = 4
    x1 = jax.random.normal(k_x1, (B1, SEQ_LEN, 2 * HIDDEN_UNITS), jnp.float32)
    out1 = discriminator_forward(x1, w, b)
    jax.block_until_ready(out1)
    ref1 = jax.nn.sigmoid(x1.reshape(B1, -1) @ w.T + b)
    assert out1.shape == (B1, OUT_FEATURES) and out1.dtype == jnp.float32
    assert jnp.allclose(out1, ref1, atol=2e-5, rtol=2e-5), (
        f"max abs err {jnp.max(jnp.abs(out1 - ref1))}")

    # Case 2: bf16 activations (recommended HBM-halving path), multi-step grid
    # with a partial last tile (exercises pipelining + row masking).
    B2 = 24
    xb = jax.random.normal(k_x2, (B2, SEQ_LEN, 2 * HIDDEN_UNITS),
                           jnp.float32).astype(jnp.bfloat16)
    out2 = discriminator_forward(xb, w, b, tile_b=16)
    jax.block_until_ready(out2)
    ref2 = jax.nn.sigmoid(xb.reshape(B2, -1).astype(jnp.float32) @ w.T + b)
    assert out2.shape == (B2, OUT_FEATURES) and out2.dtype == jnp.float32
    assert jnp.allclose(out2, ref2, atol=1e-4, rtol=1e-4), (
        f"max abs err {jnp.max(jnp.abs(out2 - ref2))}")

    print("KERNEL_OK")
</pallas_src>

<mosaic_0001>
module attributes {stable_mosaic.version = 11 : i64} {
  func.func @_disc_kernel(%arg0: i32, %arg1: memref<4x11520xf32, #tpu.memory_space<vmem>>, %arg2: memref<1x11520xf32, #tpu.memory_space<vmem>>, %arg3: memref<1x1xf32, #tpu.memory_space<smem>>, %arg4: memref<4x1xf32, #tpu.memory_space<vmem>>) attributes {dimension_semantics = [#tpu.dimension_semantics<parallel>], iteration_bounds = array<i64: 1>, scalar_prefetch = 0 : i64, scratch_operands = 0 : i64, tpu.core_type = #tpu.core_type<tc>, window_params = [{transform_indices = @transform_0, window_bounds = array<i64: 4, 11520>}, {pipeline_mode = #tpu.pipeline_mode<synchronous>, transform_indices = @transform_1, window_bounds = array<i64: 1, 11520>}, {transform_indices = @transform_2, window_bounds = array<i64: 1, 1>}, {transform_indices = @transform_3, window_bounds = array<i64: 4, 1>}]} {
    %cst = arith.constant 0.000000e+00 : f32
    %0 = vector.broadcast %cst : f32 to vector<4x128xf32>
    %c0_i32 = arith.constant 0 : i32
    %c9_i32 = arith.constant 9 : i32
    %1 = arith.addi %c0_i32, %c9_i32 : i32
    %c1_i32 = arith.constant 1 : i32
    %2 = scf.for %arg5 = %c0_i32 to %1 step %c1_i32 iter_args(%arg6 = %0) -> (vector<4x128xf32>)  : i32 {
      %c1280_i32 = arith.constant 1280 : i32
      %16 = arith.muli %arg5, %c1280_i32 : i32
      %17 = tpu.assume_multiple %16, 128 : i32
      %c0_i32_8 = arith.constant 0 : i32
      %18 = arith.addi %17, %c0_i32_8 : i32
      %19 = tpu.assume_multiple %18, 128 : i32
      %c0_9 = arith.constant 0 : index
      %20 = arith.index_cast %19 : i32 to index
      %21 = vector.load %arg1[%c0_9, %20] : memref<4x11520xf32, #tpu.memory_space<vmem>>, vector<4x128xf32>
      %c0_10 = arith.constant 0 : index
      %22 = arith.index_cast %19 : i32 to index
      %23 = vector.load %arg2[%c0_10, %22] : memref<1x11520xf32, #tpu.memory_space<vmem>>, vector<1x128xf32>
      %24 = vector.broadcast %23 : vector<1x128xf32> to vector<4x128xf32>
      %25 = arith.mulf %21, %24 : vector<4x128xf32>
      %26 = arith.addf %arg6, %25 : vector<4x128xf32>
      %c128_i32 = arith.constant 128 : i32
      %27 = arith.addi %17, %c128_i32 : i32
      %28 = tpu.assume_multiple %27, 128 : i32
      %c0_11 = arith.constant 0 : index
      %29 = arith.index_cast %28 : i32 to index
      %30 = vector.load %arg1[%c0_11, %29] : memref<4x11520xf32, #tpu.memory_space<vmem>>, vector<4x128xf32>
      %c0_12 = arith.constant 0 : index
      %31 = arith.index_cast %28 : i32 to index
      %32 = vector.load %arg2[%c0_12, %31] : memref<1x11520xf32, #tpu.memory_space<vmem>>, vector<1x128xf32>
      %33 = vector.broadcast %32 : vector<1x128xf32> to vector<4x128xf32>
      %34 = arith.mulf %30, %33 : vector<4x128xf32>
      %35 = arith.addf %26, %34 : vector<4x128xf32>
      %c256_i32 = arith.constant 256 : i32
      %36 = arith.addi %17, %c256_i32 : i32
      %37 = tpu.assume_multiple %36, 128 : i32
      %c0_13 = arith.constant 0 : index
      %38 = arith.index_cast %37 : i32 to index
      %39 = vector.load %arg1[%c0_13, %38] : memref<4x11520xf32, #tpu.memory_space<vmem>>, vector<4x128xf32>
      %c0_14 = arith.constant 0 : index
      %40 = arith.index_cast %37 : i32 to index
      %41 = vector.load %arg2[%c0_14, %40] : memref<1x11520xf32, #tpu.memory_space<vmem>>, vector<1x128xf32>
      %42 = vector.broadcast %41 : vector<1x128xf32> to vector<4x128xf32>
      %43 = arith.mulf %39, %42 : vector<4x128xf32>
      %44 = arith.addf %35, %43 : vector<4x128xf32>
      %c384_i32 = arith.constant 384 : i32
      %45 = arith.addi %17, %c384_i32 : i32
      %46 = tpu.assume_multiple %45, 128 : i32
      %c0_15 = arith.constant 0 : index
      %47 = arith.index_cast %46 : i32 to index
      %48 = vector.load %arg1[%c0_15, %47] : memref<4x11520xf32, #tpu.memory_space<vmem>>, vector<4x128xf32>
      %c0_16 = arith.constant 0 : index
      %49 = arith.index_cast %46 : i32 to index
      %50 = vector.load %arg2[%c0_16, %49] : memref<1x11520xf32, #tpu.memory_space<vmem>>, vector<1x128xf32>
      %51 = vector.broadcast %50 : vector<1x128xf32> to vector<4x128xf32>
      %52 = arith.mulf %48, %51 : vector<4x128xf32>
      %53 = arith.addf %44, %52 : vector<4x128xf32>
      %c512_i32 = arith.constant 512 : i32
      %54 = arith.addi %17, %c512_i32 : i32
      %55 = tpu.assume_multiple %54, 128 : i32
      %c0_17 = arith.constant 0 : index
      %56 = arith.index_cast %55 : i32 to index
      %57 = vector.load %arg1[%c0_17, %56] : memref<4x11520xf32, #tpu.memory_space<vmem>>, vector<4x128xf32>
      %c0_18 = arith.constant 0 : index
      %58 = arith.index_cast %55 : i32 to index
      %59 = vector.load %arg2[%c0_18, %58] : memref<1x11520xf32, #tpu.memory_space<vmem>>, vector<1x128xf32>
      %60 = vector.broadcast %59 : vector<1x128xf32> to vector<4x128xf32>
      %61 = arith.mulf %57, %60 : vector<4x128xf32>
      %62 = arith.addf %53, %61 : vector<4x128xf32>
      %c640_i32 = arith.constant 640 : i32
      %63 = arith.addi %17, %c640_i32 : i32
      %64 = tpu.assume_multiple %63, 128 : i32
      %c0_19 = arith.constant 0 : index
      %65 = arith.index_cast %64 : i32 to index
      %66 = vector.load %arg1[%c0_19, %65] : memref<4x11520xf32, #tpu.memory_space<vmem>>, vector<4x128xf32>
      %c0_20 = arith.constant 0 : index
      %67 = arith.index_cast %64 : i32 to index
      %68 = vector.load %arg2[%c0_20, %67] : memref<1x11520xf32, #tpu.memory_space<vmem>>, vector<1x128xf32>
      %69 = vector.broadcast %68 : vector<1x128xf32> to vector<4x128xf32>
      %70 = arith.mulf %66, %69 : vector<4x128xf32>
      %71 = arith.addf %62, %70 : vector<4x128xf32>
      %c768_i32 = arith.constant 768 : i32
      %72 = arith.addi %17, %c768_i32 : i32
      %73 = tpu.assume_multiple %72, 128 : i32
      %c0_21 = arith.constant 0 : index
      %74 = arith.index_cast %73 : i32 to index
      %75 = vector.load %arg1[%c0_21, %74] : memref<4x11520xf32, #tpu.memory_space<vmem>>, vector<4x128xf32>
      %c0_22 = arith.constant 0 : index
      %76 = arith.index_cast %73 : i32 to index
      %77 = vector.load %arg2[%c0_22, %76] : memref<1x11520xf32, #tpu.memory_space<vmem>>, vector<1x128xf32>
      %78 = vector.broadcast %77 : vector<1x128xf32> to vector<4x128xf32>
      %79 = arith.mulf %75, %78 : vector<4x128xf32>
      %80 = arith.addf %71, %79 : vector<4x128xf32>
      %c896_i32 = arith.constant 896 : i32
      %81 = arith.addi %17, %c896_i32 : i32
      %82 = tpu.assume_multiple %81, 128 : i32
      %c0_23 = arith.constant 0 : index
      %83 = arith.index_cast %82 : i32 to index
      %84 = vector.load %arg1[%c0_23, %83] : memref<4x11520xf32, #tpu.memory_space<vmem>>, vector<4x128xf32>
      %c0_24 = arith.constant 0 : index
      %85 = arith.index_cast %82 : i32 to index
      %86 = vector.load %arg2[%c0_24, %85] : memref<1x11520xf32, #tpu.memory_space<vmem>>, vector<1x128xf32>
      %87 = vector.broadcast %86 : vector<1x128xf32> to vector<4x128xf32>
      %88 = arith.mulf %84, %87 : vector<4x128xf32>
      %89 = arith.addf %80, %88 : vector<4x128xf32>
      %c1024_i32 = arith.constant 1024 : i32
      %90 = arith.addi %17, %c1024_i32 : i32
      %91 = tpu.assume_multiple %90, 128 : i32
      %c0_25 = arith.constant 0 : index
      %92 = arith.index_cast %91 : i32 to index
      %93 = vector.load %arg1[%c0_25, %92] : memref<4x11520xf32, #tpu.memory_space<vmem>>, vector<4x128xf32>
      %c0_26 = arith.constant 0 : index
      %94 = arith.index_cast %91 : i32 to index
      %95 = vector.load %arg2[%c0_26, %94] : memref<1x11520xf32, #tpu.memory_space<vmem>>, vector<1x128xf32>
      %96 = vector.broadcast %95 : vector<1x128xf32> to vector<4x128xf32>
      %97 = arith.mulf %93, %96 : vector<4x128xf32>
      %98 = arith.addf %89, %97 : vector<4x128xf32>
      %c1152_i32 = arith.constant 1152 : i32
      %99 = arith.addi %17, %c1152_i32 : i32
      %100 = tpu.assume_multiple %99, 128 : i32
      %c0_27 = arith.constant 0 : index
      %101 = arith.index_cast %100 : i32 to index
      %102 = vector.load %arg1[%c0_27, %101] : memref<4x11520xf32, #tpu.memory_space<vmem>>, vector<4x128xf32>
      %c0_28 = arith.constant 0 : index
      %103 = arith.index_cast %100 : i32 to index
      %104 = vector.load %arg2[%c0_28, %103] : memref<1x11520xf32, #tpu.memory_space<vmem>>, vector<1x128xf32>
      %105 = vector.broadcast %104 : vector<1x128xf32> to vector<4x128xf32>
      %106 = arith.mulf %102, %105 : vector<4x128xf32>
      %107 = arith.addf %98, %106 : vector<4x128xf32>
      scf.yield %107 : vector<4x128xf32>
    }
    %c9_i32_0 = arith.constant 9 : i32
    %cst_1 = arith.constant dense<0.000000e+00> : vector<4xf32>
    %3 = vector.multi_reduction <add>, %2, %cst_1 [1] : vector<4x128xf32> to vector<4xf32>
    %4 = vector.shape_cast %3 : vector<4xf32> to vector<4x1xf32>
    %c0 = arith.constant 0 : index
    %c0_2 = arith.constant 0 : index
    %5 = memref.load %arg3[%c0, %c0_2] : memref<1x1xf32, #tpu.memory_space<smem>>
    %6 = vector.broadcast %5 : f32 to vector<4x1xf32>
    %7 = arith.addf %4, %6 : vector<4x1xf32>
    %cst_3 = arith.constant 0.000000e+00 : f32
    %8 = vector.broadcast %cst_3 : f32 to vector<4x1xf32>
    %9 = arith.subf %8, %7 : vector<4x1xf32>
    %10 = math.exp %9 : vector<4x1xf32>
    %cst_4 = arith.constant 1.000000e+00 : f32
    %11 = vector.broadcast %cst_4 : f32 to vector<4x1xf32>
    %12 = arith.addf %11, %10 : vector<4x1xf32>
    %cst_5 = arith.constant 1.000000e+00 : f32
    %13 = vector.broadcast %cst_5 : f32 to vector<4x1xf32>
    %14 = arith.divf %13, %12 : vector<4x1xf32>
    %c0_6 = arith.constant 0 : index
    %c0_7 = arith.constant 0 : index
    %15 = vector.load %arg4[%c0_6, %c0_7] : memref<4x1xf32, #tpu.memory_space<vmem>>, vector<4x1xf32>
    tpu.vector_store %arg4[%c0_6, %c0_7], %14 {strides = array<i32>} : memref<4x1xf32, #tpu.memory_space<vmem>>, vector<4x1xf32>,
    return
  }
  func.func @transform_0(%arg0: i32) -> (i32, i32) {
    %c0_i32 = arith.constant 0 : i32
    %c0_i32_0 = arith.constant 0 : i32
    return %arg0, %c0_i32 : i32, i32
  }
  func.func @transform_1(%arg0: i32) -> (i32, i32) {
    %c0_i32 = arith.constant 0 : i32
    %c0_i32_0 = arith.constant 0 : i32
    %c0_i32_1 = arith.constant 0 : i32
    return %c0_i32, %c0_i32_0 : i32, i32
  }
  func.func @transform_2(%arg0: i32) -> (i32, i32) {
    %c0_i32 = arith.constant 0 : i32
    %c0_i32_0 = arith.constant 0 : i32
    %c0_i32_1 = arith.constant 0 : i32
    return %c0_i32, %c0_i32_0 : i32, i32
  }
  func.func @transform_3(%arg0: i32) -> (i32, i32) {
    %c0_i32 = arith.constant 0 : i32
    %c0_i32_0 = arith.constant 0 : i32
    return %arg0, %c0_i32 : i32, i32
  }
}

</mosaic_0001>

<bundles_post_ra>
// kernel: tpu_custom_call.1
= control target key start
LH: loop header
LB: loop body
LE: loop exit
PB: predicated region body
PF: predicated region fallthrough
CT: control target
= control target key end

     0   :  { %s449_s0 = inlined_call_operand.hbm [shape: f32[4,11520], index: 0, kind: input, shape index: {}]   ;;  %s450_s1 = inlined_call_operand.hbm [shape: f32[1,11520], index: 1, kind: input, shape index: {}]   ;;  %s451_s2 = inlined_call_operand.<no memory space> [shape: f32[1,1], index: 2, kind: input, shape index: {}]   ;;  %s452_s3 = inlined_call_operand.vmem [shape: f32[4,1], index: 3, kind: output, shape index: {}]  }
   0x1   :  { %8 = sst [smem:[#allocation2]] %s451_s2 }
   0x2   :  { %9 = vsyncpa [#allocation4], 0 }
   0x3   :  { %10 = vsyncpa [#allocation6], 0  ;;  %s371_s14 = smov [#allocation3]   ;;  %s372_s16 = smov [#allocation5]  }
   0x4   :  { %s17_s15 = sshll.u32 %s371_s14, 4  ;;  %s27_s17 = sshll.u32 %s372_s16, 4  ;;  %s18_s15 = int_to_ptr.vmem [resolvable:$true] %s17_s15  ;;  %s28_s17 = int_to_ptr.vmem [resolvable:$true] %s27_s17 }
   0x5   :  { %s307_s20 = scalar_lea.hbm %s449_s0, 5760 }
   0x6   :  { %p308_p0 = scmp.ne.s32.totalorder %s449_s0, %s307_s20  ;;  %p311_p1 = scmp.lt.u32.totalorder %s307_s20, %s449_s0 }
   0x8   :  { %p313_p2 = pnand %p311_p1, %p308_p0 }
   0xa   :  { %316 = shalt.err (!%p313_p2)
}
   0xb   :  { %s317_s2 = scalar_lea.vmem %s18_s15, 5760  ;;  %p322_p4 = scmp.lt.s32.totalorder %s18_s15, %s18_s15 }
   0xc   :  { %p318_p3 = scmp.ne.s32.totalorder %s18_s15, %s317_s2  ;;  %p323_p5 = scmp.lt.s32.totalorder %s317_s2, %s317_s2 }
   0xe   :  { %p324_p6 = por %p323_p5, %p322_p4 }
  0x10   :  { %p325_p7 = pnand %p324_p6, %p318_p3 }
  0x12   :  { %328 = shalt.err (!%p325_p7)
}
  0x13   :  { %20 = dma.hbm_to_vmem [thread:$0]  %s449_s0, 5760, %s18_s15, [#allocation4]  }
  0x14   :  { %s329_s29 = scalar_lea.hbm %s450_s1, 1440 }
  0x15   :  { %p330_p8 = scmp.ne.s32.totalorder %s450_s1, %s329_s29  ;;  %p333_p9 = scmp.lt.u32.totalorder %s329_s29, %s450_s1 }
  0x17   :  { %p335_p10 = pnand %p333_p9, %p330_p8 }
  0x19   :  { %338 = shalt.err (!%p335_p10)
}
  0x1a   :  { %s339_s7 = scalar_lea.vmem %s28_s17, 1440  ;;  %p344_p12 = scmp.lt.s32.totalorder %s28_s17, %s28_s17 }
  0x1b   :  { %p340_p11 = scmp.ne.s32.totalorder %s28_s17, %s339_s7  ;;  %p345_p13 = scmp.lt.s32.totalorder %s339_s7, %s339_s7 }
  0x1d   :  { %p346_p0 = por %p345_p13, %p344_p12 }
  0x1f   :  { %p347_p1 = pnand %p346_p0, %p340_p11 }
  0x21   :  { %350 = shalt.err (!%p347_p1)
}
  0x22   :  { %30 = dma.hbm_to_vmem [thread:$0]  %s450_s1, 1440, %s28_s17, [#allocation6]  }
  0x23   :  { %359 = dma.done.wait [#allocation4], 5760  }
  0x24   :  { %360 = vsyncadd [#allocation4], 4294961536 }
  0x25   :  { %361 = dma.done.wait [#allocation6], 1440  }
  0x26   :  { %362 = vsyncadd [#allocation6], 4294965856  ;;  %v420_v0 = vmov 0.0   ;;  %s422_s9 = smov 0  }
  0x27 LB: > { %s429_s10 = smul.u32 1280, %s369_s9  ;;  %s44_s9 = sadd.s32 1, %s369_s9   ;;  %s369_s9 = sphi %s422_s9, %s44_s9   ;;  %v365_v0 = vphi %v420_v0, %v453_v0  }
  0x28   : > { %p41_p2 = scmp.ge.s32.totalorder %s44_s9, 9  }
  0x29   : > { %s47_s1 = sshra.s32 %s429_s10, 7  ;;  %s62_s11 = sadd.s32 128, %s429_s10  ;;  %vm206_vm0 = vcmask (%p41_p2), 1043456   ;;  %vm219_vm1 = vcmask (%p41_p2), 3072  }
  0x2a   : > { %s265_s12 = sshll.u32 %s47_s1, 2  ;;  %s52_s13 = scalar_lea.vmem [#allocation5], %s47_s1 }
  0x2b   : > { %v266_v1 = vld [vmem:[%s52_s13] ss:$0 sm:$0xff]  ;;  %s63_s14 = sshra.s32 %s62_s11, 7  ;;  %s50_s15 = scalar_lea.vmem [#allocation3], %s265_s12 }
  0x2c   : > { %v51_v2 = vld [vmem:[%s50_s15] sm:$0xf]  ;;  %s267_s16 = sshll.u32 %s63_s14, 2  ;;  %s68_s17 = scalar_lea.vmem [#allocation5], %s63_s14 }
  0x2d   : > { %v60_v3 = vmul.f32 %v266_v1, %v51_v2  ;;  %v268_v4 = vld [vmem:[%s68_s17] ss:$0 sm:$0xff]  ;;  %s78_s18 = sadd.s32 256, %s429_s10  ;;  %s66_s19 = scalar_lea.vmem [#allocation3], %s267_s16 }
  0x2e   : > { %v67_v5 = vld [vmem:[%s66_s19] sm:$0xf]  ;;  %s79_s20 = sshra.s32 %s78_s18, 7  ;;  %s94_s21 = sadd.s32 384, %s429_s10 }
  0x2f   : > { %v61_v6 = vadd.f32 %v365_v0, %v60_v3  ;;  %v76_v7 = vmul.f32 %v268_v4, %v67_v5  ;;  %s269_s22 = sshll.u32 %s79_s20, 2  ;;  %s84_s23 = scalar_lea.vmem [#allocation5], %s79_s20 }
  0x30   : > { %v270_v8 = vld [vmem:[%s84_s23] ss:$0 sm:$0xff]  ;;  %s95_s24 = sshra.s32 %s94_s21, 7  ;;  %s82_s2 = scalar_lea.vmem [#allocation3], %s269_s22 }
  0x31   : > { %v77_v9 = vadd.f32 %v76_v7, %v61_v6  ;;  %v83_v10 = vld [vmem:[%s82_s2] sm:$0xf]  ;;  %s271_s25 = sshll.u32 %s95_s24, 2  ;;  %s100_s26 = scalar_lea.vmem [#allocation5], %s95_s24 }
  0x32   : > { %v92_v11 = vmul.f32 %v270_v8, %v83_v10  ;;  %v272_v12 = vld [vmem:[%s100_s26] ss:$0 sm:$0xff]  ;;  %s110_s27 = sadd.s32 512, %s429_s10  ;;  %s98_s28 = scalar_lea.vmem [#allocation3], %s271_s25 }
  0x33   : > { %v99_v13 = vld [vmem:[%s98_s28] sm:$0xf]  ;;  %s111_s29 = sshra.s32 %s110_s27, 7  ;;  %s126_s30 = sadd.s32 640, %s429_s10 }
  0x34   : > { %v93_v14 = vadd.f32 %v92_v11, %v77_v9  ;;  %v108_v15 = vmul.f32 %v272_v12, %v99_v13  ;;  %s273_s4 = sshll.u32 %s111_s29, 2  ;;  %s116_s5 = scalar_lea.vmem [#allocation5], %s111_s29 }
  0x35   : > { %v274_v16 = vld [vmem:[%s116_s5] ss:$0 sm:$0xff]  ;;  %s127_s6 = sshra.s32 %s126_s30, 7  ;;  %s114_s7 = scalar_lea.vmem [#allocation3], %s273_s4 }
  0x36   : > { %v109_v17 = vadd.f32 %v108_v15, %v93_v14  ;;  %v115_v18 = vld [vmem:[%s114_s7] sm:$0xf]  ;;  %s275_s0 = sshll.u32 %s127_s6, 2  ;;  %s132_s8 = scalar_lea.vmem [#allocation5], %s127_s6 }
  0x37   : > { %v124_v19 = vmul.f32 %v274_v16, %v115_v18  ;;  %v276_v20 = vld [vmem:[%s132_s8] ss:$0 sm:$0xff]  ;;  %s142_s1 = sadd.s32 768, %s429_s10  ;;  %s130_s11 = scalar_lea.vmem [#allocation3], %s275_s0 }
  0x38   : > { %v131_v21 = vld [vmem:[%s130_s11] sm:$0xf]  ;;  %s143_s12 = sshra.s32 %s142_s1, 7  ;;  %s158_s13 = sadd.s32 896, %s429_s10 }
  0x39   : > { %v125_v22 = vadd.f32 %v124_v19, %v109_v17  ;;  %v140_v23 = vmul.f32 %v276_v20, %v131_v21  ;;  %s277_s14 = sshll.u32 %s143_s12, 2  ;;  %s148_s15 = scalar_lea.vmem [#allocation5], %s143_s12 }
  0x3a   : > { %v278_v24 = vld [vmem:[%s148_s15] ss:$0 sm:$0xff]  ;;  %s159_s16 = sshra.s32 %s158_s13, 7  ;;  %s146_s17 = scalar_lea.vmem [#allocation3], %s277_s14 }
  0x3b   : > { %v141_v25 = vadd.f32 %v140_v23, %v125_v22  ;;  %v147_v26 = vld [vmem:[%s146_s17] sm:$0xf]  ;;  %s279_s18 = sshll.u32 %s159_s16, 2  ;;  %s164_s19 = scalar_lea.vmem [#allocation5], %s159_s16 }
  0x3c   : > { %v156_v27 = vmul.f32 %v278_v24, %v147_v26  ;;  %v280_v28 = vld [vmem:[%s164_s19] ss:$0 sm:$0xff]  ;;  %s174_s20 = sadd.s32 1024, %s429_s10  ;;  %s162_s21 = scalar_lea.vmem [#allocation3], %s279_s18 }
  0x3d   : > { %v163_v29 = vld [vmem:[%s162_s21] sm:$0xf]  ;;  %s175_s22 = sshra.s32 %s174_s20, 7  ;;  %s190_s23 = sadd.s32 1152, %s429_s10 }
  0x3e   : > { %v157_v30 = vadd.f32 %v156_v27, %v141_v25  ;;  %v172_v31 = vmul.f32 %v280_v28, %v163_v29  ;;  %s281_s24 = sshll.u32 %s175_s22, 2  ;;  %s180_s2 = scalar_lea.vmem [#allocation5], %s175_s22 }
  0x3f   : > { %v282_v32 = vld [vmem:[%s180_s2] ss:$0 sm:$0xff]  ;;  %s191_s25 = sshra.s32 %s190_s23, 7  ;;  %s178_s26 = scalar_lea.vmem [#allocation3], %s281_s24 }
  0x40   : > { %v173_v33 = vadd.f32 %v172_v31, %v157_v30  ;;  %v179_v34 = vld [vmem:[%s178_s26] sm:$0xf]  ;;  %s283_s27 = sshll.u32 %s191_s25, 2  ;;  %s196_s28 = scalar_lea.vmem [#allocation5], %s191_s25 }
  0x41   : > { %v188_v35 = vmul.f32 %v282_v32, %v179_v34  ;;  %v284_v36 = vld [vmem:[%s196_s28] ss:$0 sm:$0xff]  ;;  %s194_s29 = scalar_lea.vmem [#allocation3], %s283_s27  ;;  %43 = sbr.rel (!%p41_p2) target bundleno = 39 (0x27), region = 67 }
  0x42   : > { %v195_v37 = vld [vmem:[%s194_s29] sm:$0xf]  ;;  %s210_s10 = sld [smem:[#allocation2]] (%p41_p2) }
  0x43   : > { %v189_v38 = vadd.f32 %v188_v35, %v173_v33  ;;  %v204_v39 = vmul.f32 %v284_v36, %v195_v37 }
  0x45   : > { %v205_v40 = vadd.f32 %v204_v39, %v189_v38  }
  0x47   : > { %v453_v0 = vmov %v205_v40  ;;  %v207_v41 = vsel (%p41_p2), %vm206_vm0, %v205_v40, 0.0 }
  0x48   :  { %208 = vadd.xlane.f32.xlu0 %v207_v41  ;;  %v211_v42 = vstv %s210_s10 }
  0xd5   :  { %v209_v43 = vpop.xlane.xlu0 %208 }
  0xd6   :  { %v212_v44 = vadd.f32 %v211_v42, %v209_v43 }
  0xd8   :  { %v213_v45 = vsub.f32 0.0, %v212_v44 }
  0xda   :  { %v214_v46 = vmul.f32 1.442695, %v213_v45 }
  0xdc   :  { %303 = vpow2.f32 %v214_v46 }
  0xe6   :  { %v304_v47 = vpop.eup %303 }
  0xe7   :  { %v216_v48 = vadd.f32 1.0, %v304_v47 }
  0xe9   :  { %305 = vrcp.f32 %v216_v48 }
  0xf3   :  { %v306_v49 = vpop.eup %305 }
  0xf4   :  { %220 = vst.msk [vmem:[%s452_s3] sm:$0xf] %vm219_vm1, %v306_v49 }
  0xf5   :  { %225 = vsyncpa [#allocation4], 1 }
  0xf6   :  { %226 = vsyncpa [#allocation6], 1 }

</bundles_post_ra>
